<compile_context>
chip_gen: v5e
topology: v5e:2x2
jax: 0.10.0
libtpu: 0.0.40
codegen_flags: <defaults>
</compile_context>

<pallas_src>
import functools

import jax
import jax.numpy as jnp
from jax import lax
from jax.experimental import pallas as pl
from jax.experimental.pallas import tpu as pltpu

LANES = 128
_VMEM_TILE_BUDGET = 8 << 20   # bytes allowed for one double-buffered f32 feature tile


# ----------------------------------------------------------------------------
# Kernels
# ----------------------------------------------------------------------------
def _gram_kernel(f_ref, o_ref, acc_ref, *, inv_norm):
    """Accumulate G = F @ F.T over K tiles; scale by inv_norm at the end."""
    k = pl.program_id(0)

    @pl.when(k == 0)
    def _():
        acc_ref[...] = jnp.zeros_like(acc_ref)

    f = f_ref[...].astype(jnp.float32)
    # F_tile @ F_tile.T without materializing a transpose (contract on axis 1).
    acc_ref[...] += lax.dot_general(
        f, f, (((1,), (1,)), ((), ())), preferred_element_type=jnp.float32)

    @pl.when(k == pl.num_programs(0) - 1)
    def _():
        o_ref[...] = (acc_ref[...] * inv_norm).astype(o_ref.dtype)


def _gram_mse_kernel(f_ref, tgt_ref, o_ref, acc_ref, *, inv_norm, inv_mm):
    """Fused: accumulate Gram of F over K tiles, then MSE against target Gram."""
    k = pl.program_id(0)

    @pl.when(k == 0)
    def _():
        acc_ref[...] = jnp.zeros_like(acc_ref)

    f = f_ref[...].astype(jnp.float32)
    acc_ref[...] += lax.dot_general(
        f, f, (((1,), (1,)), ((), ())), preferred_element_type=jnp.float32)

    @pl.when(k == pl.num_programs(0) - 1)
    def _():
        d = acc_ref[...] * inv_norm - tgt_ref[...].astype(jnp.float32)
        # Single final reduce; fold the 1/(M*M) mean so the output is the MSE.
        o_ref[...] = jnp.sum(d * d, keepdims=True) * inv_mm


# ----------------------------------------------------------------------------
# Wrappers
# ----------------------------------------------------------------------------
def _prep_features(x):
    """(b,c,h,w) -> (M, K_pad) feature slab. Pads K only if K % 128 != 0."""
    b, c, h, w = x.shape
    M = b * c
    K = h * w
    f = x.reshape(M, K)                       # free: contiguous reshape
    K_pad = pl.cdiv(K, LANES) * LANES
    if K_pad != K:
        # Zero columns contribute 0 to F @ F.T -> exact Gram with true norm.
        f = jnp.pad(f, ((0, 0), (0, K_pad - K)))
    return f, M, K, K_pad


def _pick_tk(K_pad, M):
    """Largest lane-dense K tile (multiple of 128) dividing K_pad within budget."""
    n_blocks = K_pad // LANES
    # Double-buffered f32 feature tile must stay under the scratch budget.
    budget_blocks = max(1, _VMEM_TILE_BUDGET // (2 * 4 * M * LANES))
    max_blocks = max(1, min(n_blocks, budget_blocks, 16))   # cap tk at 2048
    for nb in range(max_blocks, 0, -1):
        if n_blocks % nb == 0:
            return nb * LANES
    return LANES


_COMPILER_PARAMS = pltpu.CompilerParams(
    dimension_semantics=("arbitrary",),       # K is a reduction axis
    vmem_limit_bytes=32 * 1024 * 1024,        # portable across v5e/v6e/v7x
)


def gram_matrix_pallas(x):
    """G = (F @ F.T) / (b*c*h*w), F = x.reshape(b*c, h*w)."""
    f, M, K, K_pad = _prep_features(x)
    tk = _pick_tk(K_pad, M)
    grid = (K_pad // tk,)
    inv_norm = 1.0 / float(M * K)

    return pl.pallas_call(
        functools.partial(_gram_kernel, inv_norm=inv_norm),
        out_shape=jax.ShapeDtypeStruct((M, M), jnp.float32),
        grid_spec=pltpu.PrefetchScalarGridSpec(
            num_scalar_prefetch=0,
            grid=grid,
            in_specs=[pl.BlockSpec((M, tk), lambda k: (0, k))],
            out_specs=pl.BlockSpec((M, M), lambda k: (0, 0)),
            scratch_shapes=[pltpu.VMEM((M, M), jnp.float32)],
        ),
        compiler_params=_COMPILER_PARAMS,
    )(f)


def gram_mse_pallas(x, target_gram):
    """mean((Gram(x) - target_gram)**2); Gram + MSE fused in one kernel."""
    f, M, K, K_pad = _prep_features(x)
    assert target_gram.shape == (M, M), (target_gram.shape, M)
    tk = _pick_tk(K_pad, M)
    grid = (K_pad // tk,)
    inv_norm = 1.0 / float(M * K)
    inv_mm = 1.0 / float(M * M)               # F.mse_loss 'mean' over M*M elems

    mse = pl.pallas_call(
        functools.partial(_gram_mse_kernel, inv_norm=inv_norm, inv_mm=inv_mm),
        out_shape=jax.ShapeDtypeStruct((1, 1), jnp.float32),
        grid_spec=pltpu.PrefetchScalarGridSpec(
            num_scalar_prefetch=0,
            grid=grid,
            in_specs=[
                pl.BlockSpec((M, tk), lambda k: (0, k)),   # feature K tiles
                pl.BlockSpec((M, M), lambda k: (0, 0)),    # target Gram (resident)
            ],
            out_specs=pl.BlockSpec((1, 1), lambda k: (0, 0)),
            scratch_shapes=[pltpu.VMEM((M, M), jnp.float32)],
        ),
        compiler_params=_COMPILER_PARAMS,
    )(f, target_gram)

    return mse[0, 0]


# ----------------------------------------------------------------------------
# Module
# ----------------------------------------------------------------------------
class StyleLossPallas:
    """JAX/Pallas port of the PyTorch StyleLoss module."""

    def __init__(self, target_feature):
        # gram_matrix(target).detach() == stop_gradient here.
        self.target_vects = {
            i: jax.lax.stop_gradient(gram_matrix_pallas(v))
            for i, v in enumerate(target_feature)
        }
        self._weight = 1000000000.0
        self.layers = [0, 1, 2, 3, 4]
        self.layer_weights = [10, 5, 1, 1, 1]

    def __call__(self, x):
        loss = []
        for i in self.layers:
            layer_loss = gram_mse_pallas(x[i], self.target_vects[i])
            loss.append(layer_loss * self.layer_weights[i])
        self.loss = sum(loss) * self._weight
        return self.loss


if __name__ == "__main__":
    key = jax.random.PRNGKey(0)
    n_feats = 5                      # layers 0..4
    B, C, H, W = 2, 4, 16, 16        # NCHW, like the PyTorch conv feature maps

    keys = jax.random.split(key, 2 * n_feats)
    x_feats = [jax.random.normal(keys[i], (B, C, H, W), dtype=jnp.float32)
               for i in range(n_feats)]
    t_feats = [jax.random.normal(keys[n_feats + i], (B, C, H, W), dtype=jnp.float32)
               for i in range(n_feats)]

    module = StyleLossPallas(t_feats)
    loss = module(x_feats)
    loss = jax.block_until_ready(loss)

    # Plain-JAX reference check.
    def ref_gram(a):
        b, c, h, w = a.shape
        f = a.reshape(b * c, h * w)
        return jnp.matmul(f, f.T, precision=jax.lax.Precision.HIGHEST) / (b * c * h * w)

    ref = 0.0
    for i, lw in zip([0, 1, 2, 3, 4], [10, 5, 1, 1, 1]):
        Gx = ref_gram(x_feats[i])
        Gt = ref_gram(t_feats[i])
        ref = ref + jnp.mean((Gx - Gt) ** 2) * lw
    ref = ref * 1000000000.0

    rel_err = jnp.abs(loss - ref) / jnp.maximum(jnp.abs(ref), 1e-30)
    assert rel_err < 1e-3, (loss, ref, rel_err)

    print("KERNEL_OK")
</pallas_src>

<mosaic_0001>
module attributes {stable_mosaic.version = 11 : i64} {
  func.func @_gram_kernel(%arg0: i32, %arg1: memref<8x256xf32, #tpu.memory_space<vmem>>, %arg2: memref<8x8xf32, #tpu.memory_space<vmem>>, %arg3: memref<8x8xf32, #tpu.memory_space<vmem>>) attributes {dimension_semantics = [#tpu.dimension_semantics<arbitrary>], iteration_bounds = array<i64: 1>, scalar_prefetch = 0 : i64, scratch_operands = 1 : i64, tpu.core_type = #tpu.core_type<tc>, window_params = [{transform_indices = @transform_0, window_bounds = array<i64: 8, 256>}, {pipeline_mode = #tpu.pipeline_mode<synchronous>, transform_indices = @transform_1, window_bounds = array<i64: 8, 8>}]} {
    %c0_i32 = arith.constant 0 : i32
    %0 = arith.cmpi eq, %arg0, %c0_i32 : i32
    %1 = arith.extui %0 : i1 to i32
    %c0_i32_0 = arith.constant 0 : i32
    %2 = arith.cmpi ne, %1, %c0_i32_0 : i32
    scf.if %2 {
      %cst_8 = arith.constant 0.000000e+00 : f32
      %11 = vector.broadcast %cst_8 : f32 to vector<8x8xf32>
      %c0_9 = arith.constant 0 : index
      %c0_10 = arith.constant 0 : index
      %12 = vector.load %arg3[%c0_9, %c0_10] : memref<8x8xf32, #tpu.memory_space<vmem>>, vector<8x8xf32>
      tpu.vector_store %arg3[%c0_9, %c0_10], %11 {strides = array<i32>} : memref<8x8xf32, #tpu.memory_space<vmem>>, vector<8x8xf32>,
    } else {
    }
    %c0 = arith.constant 0 : index
    %c0_1 = arith.constant 0 : index
    %3 = vector.load %arg1[%c0, %c0_1] : memref<8x256xf32, #tpu.memory_space<vmem>>, vector<8x256xf32>
    %c0_2 = arith.constant 0 : index
    %c0_3 = arith.constant 0 : index
    %4 = vector.load %arg3[%c0_2, %c0_3] : memref<8x8xf32, #tpu.memory_space<vmem>>, vector<8x8xf32>
    %cst = arith.constant dense<0.000000e+00> : vector<8x8xf32>
    %5 = tpu.matmul %3, %3, %cst {dimension_numbers = #tpu.dot_dimension_numbers<[1], [1], [0], [0], [0, 0, 1, 0], [], []>} : vector<8x256xf32>, vector<8x256xf32>, vector<8x8xf32> -> vector<8x8xf32>
    %6 = arith.addf %4, %5 : vector<8x8xf32>
    %c0_4 = arith.constant 0 : index
    %c0_5 = arith.constant 0 : index
    %7 = vector.load %arg3[%c0_4, %c0_5] : memref<8x8xf32, #tpu.memory_space<vmem>>, vector<8x8xf32>
    tpu.vector_store %arg3[%c0_4, %c0_5], %6 {strides = array<i32>} : memref<8x8xf32, #tpu.memory_space<vmem>>, vector<8x8xf32>,
    %c0_i32_6 = arith.constant 0 : i32
    %8 = arith.cmpi eq, %arg0, %c0_i32_6 : i32
    %9 = arith.extui %8 : i1 to i32
    %c0_i32_7 = arith.constant 0 : i32
    %10 = arith.cmpi ne, %9, %c0_i32_7 : i32
    scf.if %10 {
      %c0_8 = arith.constant 0 : index
      %c0_9 = arith.constant 0 : index
      %11 = vector.load %arg3[%c0_8, %c0_9] : memref<8x8xf32, #tpu.memory_space<vmem>>, vector<8x8xf32>
      %cst_10 = arith.constant 4.8828125E-4 : f32
      %12 = vector.broadcast %cst_10 : f32 to vector<8x8xf32>
      %13 = arith.mulf %11, %12 : vector<8x8xf32>
      %c0_11 = arith.constant 0 : index
      %c0_12 = arith.constant 0 : index
      %14 = vector.load %arg2[%c0_11, %c0_12] : memref<8x8xf32, #tpu.memory_space<vmem>>, vector<8x8xf32>
      tpu.vector_store %arg2[%c0_11, %c0_12], %13 {strides = array<i32>} : memref<8x8xf32, #tpu.memory_space<vmem>>, vector<8x8xf32>,
    } else {
    }
    return
  }
  func.func @transform_0(%arg0: i32) -> (i32, i32) {
    %c0_i32 = arith.constant 0 : i32
    %c0_i32_0 = arith.constant 0 : i32
    return %c0_i32, %arg0 : i32, i32
  }
  func.func @transform_1(%arg0: i32) -> (i32, i32) {
    %c0_i32 = arith.constant 0 : i32
    %c0_i32_0 = arith.constant 0 : i32
    %c0_i32_1 = arith.constant 0 : i32
    return %c0_i32, %c0_i32_0 : i32, i32
  }
}

</mosaic_0001>

<bundles_post_ra>
// kernel: tpu_custom_call.1
= control target key start
LH: loop header
LB: loop body
LE: loop exit
PB: predicated region body
PF: predicated region fallthrough
CT: control target
= control target key end

     0   :  { %6 = vsyncpa [#allocation4], 0  ;;  %s175_s0 = inlined_call_operand.hbm [shape: f32[8,256], index: 0, kind: input, shape index: {}]   ;;  %s176_s1 = inlined_call_operand.hbm [shape: f32[8,8], index: 1, kind: output, shape index: {}]  }
   0x1   :  { %7 = vsyncpa [#allocation5], 0  ;;  %s13_s8 = sshll.u32 %s175_s0, 4  ;;  %s153_s9 = smov [#allocation3]   ;;  %s14_s8 = int_to_ptr.hbm [resolvable:$true] %s13_s8 }
   0x2   :  { %s15_s10 = sshll.u32 %s153_s9, 4  ;;  %s16_s10 = int_to_ptr.vmem [resolvable:$true] %s15_s10 }
   0x3   :  { %18 = dma.hbm_to_vmem [thread:$0]  %s14_s8, 256, %s16_s10, [#allocation4]  }
   0x4   :  { %149 = dma.done.wait [#allocation4], 256  }
   0x5   :  { %150 = vsyncadd [#allocation4], 4294967040  ;;  %v29_v0 = vld [vmem:[#allocation3] sm:$0xff]  ;;  %v30_v1 = vld [vmem:[#allocation3 + $0x8] sm:$0xff]  ;;  %vm27_vm0 = vcmask 64512   ;;  %v154_v2 = vmov 0.0  }
   0x6   :  { %47 = vmatpush.xpose.msra.mxu0 %v29_v0  ;;  %67 = vmatpush.xpose.msra.mxu1 %v30_v1  ;;  %28 = vst.msk [vmem:[#allocation2] sm:$0xff] %vm27_vm0, %v154_v2  ;;  %s155_s0 = smov [#allocation6]   ;;  %s88_s14 = sshll.u32 %s176_s1, 4  ;;  %s89_s14 = int_to_ptr.hbm [resolvable:$true] %s88_s14 }
   0x7   :  { %s86_s11 = sshll.u32 %s155_s0, 4  ;;  %s87_s11 = int_to_ptr.vmem [resolvable:$true] %s86_s11 }
   0x9   :  { %48 = vmatmul.f32.vlgmr.msra.gmra.mxu0 %v29_v0  ;;  %68 = vmatmul.f32.vlgmr.msra.gmra.mxu1 %v30_v1 }
   0xd   :  { %v31_v4 = vld [vmem:[#allocation2] sm:$0xff] }
  0x86   :  { %v49_v3 = vpop.f32.mrf.mxu0  ;;  %v69_v5 = vpop.f32.mrf.mxu1 }
  0x87   :  { %v70_v6 = vadd.f32 %v69_v5, %v49_v3 }
  0x89   :  { %v72_v7 = vadd.f32 %v70_v6, %v31_v4 }
  0x8b   :  { %74 = vst.msk [vmem:[#allocation2] sm:$0xff] %vm27_vm0, %v72_v7 }
  0x92   :  { %v78_v8 = vld [vmem:[#allocation2] sm:$0xff] }
  0x93   :  { %v79_v9 = vmul.f32 0.00048828125, %v78_v8 }
  0x95   :  { %80 = vst.msk [vmem:[#allocation6] sm:$0xff] %vm27_vm0, %v79_v9 }
  0x96   :  { %91 = dma.vmem_to_hbm [thread:$0]  %s87_s11, 128, %s89_s14, [#allocation5]  }
  0x97   :  { %151 = dma.done.wait [#allocation5], 128  }
  0x98   :  { %152 = vsyncadd [#allocation5], 4294967168 }
  0x99   :  { %96 = vsyncpa [#allocation4], 1 }
  0x9a   :  { %97 = vsyncpa [#allocation5], 1 }

</bundles_post_ra>
